<compile_context>
chip_gen: v7x
topology: tpu7x:2x2x1
jax: 0.10.0
libtpu: 0.0.40
codegen_flags: <defaults>
</compile_context>

<pallas_src>
import numpy as np
import jax
import jax.numpy as jnp
from jax.experimental import pallas as pl
from jax.experimental.pallas import tpu as pltpu


# ---------------- anchor configuration (matches the PyTorch module defaults) --
PYRAMID_LEVELS = [3, 4, 5, 6, 7]
STRIDES = [2 ** x for x in PYRAMID_LEVELS]
SIZES = [2 ** (x + 2) for x in PYRAMID_LEVELS]
RATIOS = np.array([0.5, 1.0, 2.0])
SCALES = np.array([2 ** 0, 2 ** (1.0 / 3.0), 2 ** (2.0 / 3.0)])


def _round_up(x, m):
    return (x + m - 1) // m * m


def _base_anchors(base_size, ratios, scales):
    """Base (un-shifted) anchors for one level, exactly as in the PyTorch code."""
    num_anchors = len(ratios) * len(scales)
    anchors = np.zeros((num_anchors, 4))
    anchors[:, 2:] = base_size * np.tile(scales, (2, len(ratios))).T
    areas = anchors[:, 2] * anchors[:, 3]
    anchors[:, 2] = np.sqrt(areas / np.repeat(ratios, len(scales)))
    anchors[:, 3] = anchors[:, 2] * np.repeat(ratios, len(scales))
    anchors[:, 0::2] -= np.tile(anchors[:, 2] * 0.5, (2, 1)).T
    anchors[:, 1::2] -= np.tile(anchors[:, 3] * 0.5, (2, 1)).T
    return anchors


# --------------------------------- kernel ------------------------------------
def _anchors_kernel(base_ref, mask_ref, ycol_ref, out_ref):
    """out[y, j] = base[j] + mask[j] * y   (pure VPU broadcast-FMA).

    base_ref : (1, L)        per-lane constant (x-shift + 0.5*stride folded in)
    mask_ref : (1, L)        per-lane stride for y-coordinate lanes, else 0
    ycol_ref : (rows, 1)     row index column (float)
    out_ref  : (rows, L)     L is a multiple of 128 -> unmasked full-vreg stores
    """
    out_ref[...] = base_ref[...] + mask_ref[...] * ycol_ref[...]


# --------------------------------- wrapper -----------------------------------
def anchors_forward(image):
    """Pallas equivalent of Anchors.forward: returns (1, total_anchors, 4) f32."""
    img_h, img_w = int(image.shape[2]), int(image.shape[3])
    A = len(RATIOS) * len(SCALES)        # 9 anchors per cell
    A4 = A * 4                           # 36 values per cell

    # coordinate order per anchor is (x1, y1, x2, y2)
    coord_is_x = np.tile(np.array([1.0, 0.0, 1.0, 0.0]), A)   # (36,)
    coord_is_y = 1.0 - coord_is_x

    level_meta = []                      # (h, w, lane_off, lane_width)
    base_cols, mask_cols = [], []
    lane_off = 0
    h_max = 0

    for idx, p in enumerate(PYRAMID_LEVELS):
        stride = float(STRIDES[idx])
        h = -(-img_h // (2 ** p))        # ceil div, as in the reference
        w = -(-img_w // (2 ** p))
        h_max = max(h_max, h)

        base = _base_anchors(SIZES[idx], RATIOS, SCALES).reshape(-1)   # (36,) f64
        xs = np.arange(w, dtype=np.float64)

        # out[y, x*36+c] = base[c] + is_x[c]*(x+0.5)*stride + is_y[c]*(y+0.5)*stride
        #                = B[x*36+c] + M[c] * y
        B = (base[None, :]
             + coord_is_x[None, :] * (xs[:, None] + 0.5) * stride
             + coord_is_y[None, :] * (0.5 * stride))                   # (w, 36)
        M = np.tile(coord_is_y * stride, (w, 1))                       # (w, 36)

        width = w * A4
        width_pad = _round_up(width, 128)          # lane-align each level
        Bp = np.zeros((width_pad,), np.float64); Bp[:width] = B.reshape(-1)
        Mp = np.zeros((width_pad,), np.float64); Mp[:width] = M.reshape(-1)
        base_cols.append(Bp)
        mask_cols.append(Mp)

        level_meta.append((h, w, lane_off, width))
        lane_off += width_pad

    l_tot = lane_off                               # multiple of 128
    h_pad = _round_up(max(h_max, 8), 8)            # sublane-align rows

    # Coarse row grid: single block for small inputs; 64-row blocks (parallel
    # across v7x's two TensorCores, double-buffered writeback, bounded VMEM)
    # for large detection inputs.
    if h_pad <= 128:
        row_tile = h_pad
    else:
        row_tile = 64
        h_pad = _round_up(h_pad, row_tile)
    grid = (h_pad // row_tile,)

    base_row = jnp.asarray(np.concatenate(base_cols)[None, :], jnp.float32)  # (1, Ltot)
    mask_row = jnp.asarray(np.concatenate(mask_cols)[None, :], jnp.float32)  # (1, Ltot)
    ycol = jnp.asarray(np.arange(h_pad, dtype=np.float32)[:, None])          # (Hpad, 1)

    cost = pl.CostEstimate(
        flops=2 * h_pad * l_tot,
        transcendentals=0,
        bytes_accessed=4 * (h_pad * l_tot + 2 * l_tot + h_pad),
    )

    out = pl.pallas_call(
        _anchors_kernel,
        out_shape=jax.ShapeDtypeStruct((h_pad, l_tot), jnp.float32),
        grid=grid,
        in_specs=[
            pl.BlockSpec((1, l_tot), lambda i: (0, 0)),        # base (resident)
            pl.BlockSpec((1, l_tot), lambda i: (0, 0)),        # mask (resident)
            pl.BlockSpec((row_tile, 1), lambda i: (i, 0)),     # row column
        ],
        out_specs=pl.BlockSpec((row_tile, l_tot), lambda i: (i, 0)),
        compiler_params=pltpu.CompilerParams(
            dimension_semantics=("parallel",)),
        cost_estimate=cost,
    )(base_row, mask_row, ycol)

    # Strip row/lane padding and restore the PyTorch (y, x, anchor, coord)
    # flattening per level, then concatenate levels.  Pure layout plumbing on a
    # tiny tensor; kept in the wrapper so every kernel store stays lane-dense.
    # TODO(synk): for very large images this epilogue could be replaced by
    # manual per-level DMAs into a flat HBM output to avoid the extra copy.
    per_level = []
    for (h, w, off, width) in level_meta:
        lvl = out[:h, off:off + width].reshape(h * w * A, 4)
        per_level.append(lvl)
    all_anchors = jnp.concatenate(per_level, axis=0)
    return all_anchors[None, :, :].astype(jnp.float32)


# --------------------------- pure-numpy reference -----------------------------
def _ref_anchors(image_shape_hw):
    """Exact transcription of the PyTorch Anchors.forward numpy math."""
    image_shape = np.array(image_shape_hw)
    image_shapes = [(image_shape + 2 ** x - 1) // (2 ** x) for x in PYRAMID_LEVELS]
    all_anchors = np.zeros((0, 4)).astype(np.float32)
    for idx, p in enumerate(PYRAMID_LEVELS):
        anchors = _base_anchors(SIZES[idx], RATIOS, SCALES)
        shape = image_shapes[idx]
        stride = STRIDES[idx]
        shift_x = (np.arange(0, shape[1]) + 0.5) * stride
        shift_y = (np.arange(0, shape[0]) + 0.5) * stride
        shift_x, shift_y = np.meshgrid(shift_x, shift_y)
        shifts = np.vstack((shift_x.ravel(), shift_y.ravel(),
                            shift_x.ravel(), shift_y.ravel())).transpose()
        num_a = anchors.shape[0]
        num_k = shifts.shape[0]
        shifted = (anchors.reshape((1, num_a, 4)) +
                   shifts.reshape((1, num_k, 4)).transpose((1, 0, 2))
                   ).reshape((num_k * num_a, 4))
        all_anchors = np.append(all_anchors, shifted, axis=0)
    return np.expand_dims(all_anchors, axis=0).astype(np.float32)


if __name__ == "__main__":
    key = jax.random.PRNGKey(0)
    # NCHW image like the PyTorch module; only its spatial shape matters.
    image = jax.random.normal(key, (2, 3, 64, 64), jnp.float32)

    out = anchors_forward(image)
    out = jax.block_until_ready(out)

    ref = _ref_anchors((image.shape[2], image.shape[3]))
    assert out.shape == ref.shape, (out.shape, ref.shape)
    np.testing.assert_allclose(np.asarray(out), ref, rtol=1e-5, atol=1e-3)
    print("KERNEL_OK")
</pallas_src>

<mosaic_0001>
module attributes {stable_mosaic.version = 11 : i64} {
  func.func @_anchors_kernel(%arg0: i32, %arg1: memref<1x1024xf32, #tpu.memory_space<vmem>>, %arg2: memref<1x1024xf32, #tpu.memory_space<vmem>>, %arg3: memref<8x1xf32, #tpu.memory_space<vmem>>, %arg4: memref<8x1024xf32, #tpu.memory_space<vmem>>) attributes {dimension_semantics = [#tpu.dimension_semantics<parallel>], iteration_bounds = array<i64: 1>, scalar_prefetch = 0 : i64, scratch_operands = 0 : i64, tpu.core_type = #tpu.core_type<tc>, window_params = [{pipeline_mode = #tpu.pipeline_mode<synchronous>, transform_indices = @transform_0, window_bounds = array<i64: 1, 1024>}, {pipeline_mode = #tpu.pipeline_mode<synchronous>, transform_indices = @transform_1, window_bounds = array<i64: 1, 1024>}, {transform_indices = @transform_2, window_bounds = array<i64: 8, 1>}, {transform_indices = @transform_3, window_bounds = array<i64: 8, 1024>}]} {
    %c0 = arith.constant 0 : index
    %c0_0 = arith.constant 0 : index
    %0 = vector.load %arg1[%c0, %c0_0] : memref<1x1024xf32, #tpu.memory_space<vmem>>, vector<1x1024xf32>
    %c0_1 = arith.constant 0 : index
    %c0_2 = arith.constant 0 : index
    %1 = vector.load %arg2[%c0_1, %c0_2] : memref<1x1024xf32, #tpu.memory_space<vmem>>, vector<1x1024xf32>
    %c0_3 = arith.constant 0 : index
    %c0_4 = arith.constant 0 : index
    %2 = vector.load %arg3[%c0_3, %c0_4] : memref<8x1xf32, #tpu.memory_space<vmem>>, vector<8x1xf32>
    %3 = vector.broadcast %1 : vector<1x1024xf32> to vector<8x1024xf32>
    %4 = vector.broadcast %2 : vector<8x1xf32> to vector<8x1024xf32>
    %5 = arith.mulf %3, %4 : vector<8x1024xf32>
    %6 = vector.broadcast %0 : vector<1x1024xf32> to vector<8x1024xf32>
    %7 = arith.addf %6, %5 : vector<8x1024xf32>
    %c0_5 = arith.constant 0 : index
    %c0_6 = arith.constant 0 : index
    %8 = vector.load %arg4[%c0_5, %c0_6] : memref<8x1024xf32, #tpu.memory_space<vmem>>, vector<8x1024xf32>
    tpu.vector_store %arg4[%c0_5, %c0_6], %7 {strides = array<i32>} : memref<8x1024xf32, #tpu.memory_space<vmem>>, vector<8x1024xf32>,
    return
  }
  func.func @transform_0(%arg0: i32) -> (i32, i32) {
    %c0_i32 = arith.constant 0 : i32
    %c0_i32_0 = arith.constant 0 : i32
    %c0_i32_1 = arith.constant 0 : i32
    return %c0_i32, %c0_i32_0 : i32, i32
  }
  func.func @transform_1(%arg0: i32) -> (i32, i32) {
    %c0_i32 = arith.constant 0 : i32
    %c0_i32_0 = arith.constant 0 : i32
    %c0_i32_1 = arith.constant 0 : i32
    return %c0_i32, %c0_i32_0 : i32, i32
  }
  func.func @transform_2(%arg0: i32) -> (i32, i32) {
    %c0_i32 = arith.constant 0 : i32
    %c0_i32_0 = arith.constant 0 : i32
    return %arg0, %c0_i32 : i32, i32
  }
  func.func @transform_3(%arg0: i32) -> (i32, i32) {
    %c0_i32 = arith.constant 0 : i32
    %c0_i32_0 = arith.constant 0 : i32
    return %arg0, %c0_i32 : i32, i32
  }
}

</mosaic_0001>

<bundles_post_ra>
// kernel: tpu_custom_call.1
= control target key start
LH: loop header
LB: loop body
LE: loop exit
PB: predicated region body
PF: predicated region fallthrough
CT: control target
= control target key end

     0   :  { %8 = vsyncpa [#allocation3], 0  ;;  %s261_s0 = inlined_call_operand.vmem [shape: f32[1,1024], index: 0, kind: input, shape index: {}]   ;;  %s262_s1 = inlined_call_operand.hbm [shape: f32[1,1024], index: 1, kind: input, shape index: {}]   ;;  %s263_s2 = inlined_call_operand.vmem [shape: f32[8,1], index: 2, kind: input, shape index: {}]   ;;  %s264_s3 = inlined_call_operand.hbm [shape: f32[8,1024], index: 3, kind: output, shape index: {}]  }
   0x1   :  { %9 = vsyncpa [#allocation4], 0  ;;  %s208_s12 = smov [#allocation2]   ;;  %s160_s16 = scalar_lea.hbm %s262_s1, 128 }
   0x2   :  { %s18_s13 = sshll.u32 %s208_s12, 4  ;;  %p161_p0 = scmp.ne.s32.totalorder %s262_s1, %s160_s16  ;;  %s19_s13 = int_to_ptr.vmem [resolvable:$true] %s18_s13 }
   0x3   :  { %p164_p1 = scmp.lt.u32.totalorder %s160_s16, %s262_s1 }
   0x5   :  { %p166_p2 = pnand %p164_p1, %p161_p0 }
   0x7   :  { %169 = shalt.err (!%p166_p2)
}
   0x8   :  { %s170_s21 = scalar_lea.vmem %s19_s13, 128  ;;  %p175_p4 = scmp.lt.s32.totalorder %s19_s13, %s19_s13 }
   0x9   :  { %p171_p3 = scmp.ne.s32.totalorder %s19_s13, %s170_s21  ;;  %p176_p5 = scmp.lt.s32.totalorder %s170_s21, %s170_s21 }
   0xb   :  { %p177_p6 = por %p176_p5, %p175_p4 }
   0xd   :  { %p178_p7 = pnand %p177_p6, %p171_p3 }
   0xf   :  { %181 = shalt.err (!%p178_p7)
}
  0x10   :  { %21 = dma.hbm_to_vmem [thread:$0]  %s262_s1, 128, %s19_s13, [#allocation3]  }
  0x11   :  { %204 = dma.done.wait [#allocation3], 128  }
  0x12   :  { %205 = vsyncadd [#allocation3], 4294967168  ;;  %v209_v0 = vmov 0   ;;  %v29_v1 = vld [vmem:[%s263_s2] sm:$0xff]  ;;  %v31_v2 = vlaneseq }
  0x13   :  { %159 = vset.pattern.permute.xlu0 %v209_v0  ;;  %v28_v12 = vld [vmem:[#allocation2] sm:$0xff] }
  0x14   :  { %73 = vperm.xlu0 %159, %v29_v1   ;;  %v32_v3 = vshrl.u32 %v31_v2, 7  ;;  %v27_v13 = vld [vmem:[%s261_s0] sm:$0xff]  ;;  %s210_s0 = smov [#allocation5]  }
  0x15   :  { %s147_s2 = sshll.u32 %s210_s0, 4  ;;  %s148_s2 = int_to_ptr.vmem [resolvable:$true] %s147_s2 }
  0x16   :  { %v33_v4 = vsub.s32 0, %v32_v3  ;;  %v37_v5 = vsub.s32 1, %v32_v3  ;;  %v41_v6 = vsub.s32 2, %v32_v3  ;;  %v45_v7 = vsub.s32 3, %v32_v3  ;;  %s182_s27 = scalar_lea.vmem %s148_s2, 1024  ;;  %p187_p9 = scmp.lt.s32.totalorder %s148_s2, %s148_s2 }
  0x17   :  { %v49_v8 = vsub.s32 4, %v32_v3  ;;  %v53_v9 = vsub.s32 5, %v32_v3  ;;  %v57_v10 = vsub.s32 6, %v32_v3  ;;  %v61_v11 = vsub.s32 7, %v32_v3  ;;  %p183_p8 = scmp.ne.s32.totalorder %s148_s2, %s182_s27  ;;  %p188_p10 = scmp.lt.s32.totalorder %s182_s27, %s182_s27 }
  0x18   :  { %v34_v14 = vrot.slane %v28_v12, %v33_v4  ;;  %v38_v15 = vrot.slane %v28_v12, %v37_v5  ;;  %v42_v16 = vrot.slane %v28_v12, %v41_v6  ;;  %v46_v17 = vrot.slane %v28_v12, %v45_v7 }
  0x19   :  { %v50_v18 = vrot.slane %v28_v12, %v49_v8  ;;  %v54_v19 = vrot.slane %v28_v12, %v53_v9  ;;  %v58_v20 = vrot.slane %v28_v12, %v57_v10  ;;  %v62_v21 = vrot.slane %v28_v12, %v61_v11  ;;  %p189_p11 = por %p188_p10, %p187_p9 }
  0x1a   :  { %v88_v22 = vrot.slane %v27_v13, %v33_v4  ;;  %v92_v23 = vrot.slane %v27_v13, %v37_v5  ;;  %v96_v24 = vrot.slane %v27_v13, %v41_v6  ;;  %v100_v25 = vrot.slane %v27_v13, %v45_v7 }
  0x1b   :  { %v104_v27 = vrot.slane %v27_v13, %v49_v8  ;;  %v108_v28 = vrot.slane %v27_v13, %v53_v9  ;;  %v112_v29 = vrot.slane %v27_v13, %v57_v10  ;;  %v116_v30 = vrot.slane %v27_v13, %v61_v11  ;;  %p190_p12 = pnand %p189_p11, %p183_p8 }
  0x93   :  { %v74_v26 = vpop.permute.xlu0 %73 }
  0x94   :  { %v76_v31 = vmul.f32 %v74_v26, %v34_v14  ;;  %v77_v32 = vmul.f32 %v74_v26, %v38_v15  ;;  %v78_v33 = vmul.f32 %v74_v26, %v42_v16  ;;  %v79_v34 = vmul.f32 %v74_v26, %v46_v17 }
  0x95   :  { %v80_v35 = vmul.f32 %v74_v26, %v50_v18  ;;  %v81_v36 = vmul.f32 %v74_v26, %v54_v19  ;;  %v82_v37 = vmul.f32 %v74_v26, %v58_v20  ;;  %v83_v38 = vmul.f32 %v74_v26, %v62_v21 }
  0x96   :  { %v125_v39 = vadd.f32 %v88_v22, %v76_v31  ;;  %v126_v40 = vadd.f32 %v92_v23, %v77_v32  ;;  %v127_v41 = vadd.f32 %v96_v24, %v78_v33  ;;  %v128_v42 = vadd.f32 %v100_v25, %v79_v34 }
  0x97   :  { %v129_v43 = vadd.f32 %v104_v27, %v80_v35  ;;  %v130_v44 = vadd.f32 %v108_v28, %v81_v36  ;;  %v131_v45 = vadd.f32 %v112_v29, %v82_v37  ;;  %v132_v46 = vadd.f32 %v116_v30, %v83_v38 }
  0x98   :  { %133 = vst [vmem:[#allocation5] sm:$0xff] %v125_v39  ;;  %134 = vst [vmem:[#allocation5 + $0x8] sm:$0xff] %v126_v40 }
  0x99   :  { %135 = vst [vmem:[#allocation5 + $0x10] sm:$0xff] %v127_v41  ;;  %136 = vst [vmem:[#allocation5 + $0x18] sm:$0xff] %v128_v42 }
  0x9a   :  { %137 = vst [vmem:[#allocation5 + $0x20] sm:$0xff] %v129_v43  ;;  %138 = vst [vmem:[#allocation5 + $0x28] sm:$0xff] %v130_v44 }
  0x9b   :  { %139 = vst [vmem:[#allocation5 + $0x30] sm:$0xff] %v131_v45  ;;  %140 = vst [vmem:[#allocation5 + $0x38] sm:$0xff] %v132_v46 }
  0x9c   :  { %193 = shalt.err (!%p190_p12)
}
  0x9d   :  { %s194_s30 = scalar_lea.hbm %s264_s3, 1024 }
  0x9e   :  { %p195_p13 = scmp.ne.s32.totalorder %s264_s3, %s194_s30  ;;  %p198_p0 = scmp.lt.u32.totalorder %s194_s30, %s264_s3 }
  0xa0   :  { %p200_p1 = pnand %p198_p0, %p195_p13 }
  0xa2   :  { %203 = shalt.err (!%p200_p1)
}
  0xa3   :  { %150 = dma.vmem_to_hbm [thread:$0]  %s148_s2, 1024, %s264_s3, [#allocation4]  }
  0xa4   :  { %206 = dma.done.wait [#allocation4], 1024  }
  0xa5   :  { %207 = vsyncadd [#allocation4], 4294966272 }
  0xa6   :  { %154 = vsyncpa [#allocation3], 1 }
  0xa7   :  { %155 = vsyncpa [#allocation4], 1 }

</bundles_post_ra>
